<compile_context>
chip_gen: v7x
topology: tpu7x:2x2x1
jax: 0.10.0
libtpu: 0.0.40
codegen_flags: <defaults>
</compile_context>

<pallas_src>
import jax
import jax.numpy as jnp
from jax.experimental import pallas as pl
from jax.experimental.pallas import tpu as pltpu


LANE = 128          # pad all feature dims to multiples of the 128-lane vreg width
SUB = 16            # sublane alignment for bf16-packed tiles (16 rows / vreg)
MAX_BATCH_TILE = 256


def _round_up(n, m):
    return (n + m - 1) // m * m


def _make_mlp_kernel(layer_meta):
    """layer_meta: tuple of (row_offset, pin, pout, is_last) — all static ints."""

    def kernel(x_ref, p_ref, o_ref):
        h = x_ref[...]                                    # bf16 (tile, pin0)
        for off, pin, pout, is_last in layer_meta:
            w = p_ref[off:off + pin, :pout]               # bf16 (pin, pout), static slice
            b = p_ref[off + pin:off + pin + 1, :pout]     # bf16 (1, pout) bias row
            acc = jnp.dot(h, w, preferred_element_type=jnp.float32)   # MXU, f32 acc
            acc = acc + b.astype(jnp.float32)             # epilogue in f32
            if is_last:
                o_ref[...] = acc.astype(o_ref.dtype)
            else:
                # ReLU; Dropout(0.1) is identity in eval mode.
                # TODO(synk): training-mode Dropout(0.1) stochastic masking not implemented.
                h = jnp.maximum(acc, 0.0).astype(jnp.bfloat16)

    return kernel


def pack_params(weights, biases):
    """Pack bf16 weights + biases into one padded VMEM slab.

    Layer l occupies rows [off_l, off_l + Pin_l + SUB) of the slab:
      rows [off_l, off_l + Pin_l)  : W_l zero-padded to (Pin_l, Pout_l)
      row  off_l + Pin_l           : bias_l (remaining SUB-1 rows are zero pad)
    All offsets / extents are multiples of 16 sublanes and 128 lanes.
    """
    num_layers = len(weights)
    pins = [_round_up(w.shape[0], LANE) for w in weights]
    pouts = [_round_up(w.shape[1], LANE) for w in weights]
    max_pout = max(pouts)
    total_rows = sum(pin + SUB for pin in pins)

    slab = jnp.zeros((total_rows, max_pout), jnp.bfloat16)
    meta = []
    off = 0
    for l, (w, b) in enumerate(zip(weights, biases)):
        pin, pout = pins[l], pouts[l]
        slab = slab.at[off:off + w.shape[0], :w.shape[1]].set(w.astype(jnp.bfloat16))
        slab = slab.at[off + pin, :b.shape[-1]].set(
            b.reshape(-1).astype(jnp.bfloat16))
        meta.append((off, pin, pout, l == num_layers - 1))
        off += pin + SUB
    return slab, tuple(meta)


def rl_coach_forward(x, weights, biases):
    """Fused MLP forward.  x: (batch, in) f32; weights[i]: (in_i, out_i) f32;
    biases[i]: (1, out_i) f32.  Returns (batch, out) f32."""
    batch, in_size = x.shape
    out_size = weights[-1].shape[1]

    slab, meta = pack_params(weights, biases)
    pin0 = meta[0][1]
    pout_last = meta[-1][2]

    # Batch tiling: multiple of 8 sublanes, capped so activations stay small.
    tile = min(_round_up(batch, 8), MAX_BATCH_TILE)
    b_pad = _round_up(batch, tile)
    grid = (b_pad // tile,)

    x_pad = jnp.zeros((b_pad, pin0), jnp.bfloat16)
    x_pad = x_pad.at[:batch, :in_size].set(x.astype(jnp.bfloat16))

    kernel = _make_mlp_kernel(meta)

    flops = 2 * b_pad * sum(pin * pout for (_, pin, pout, _) in meta)
    bytes_accessed = (x_pad.size * 2          # bf16 activations in
                      + slab.size * 2         # bf16 param slab
                      + b_pad * pout_last * 4)  # f32 output

    out_pad = pl.pallas_call(
        kernel,
        out_shape=jax.ShapeDtypeStruct((b_pad, pout_last), jnp.float32),
        grid=grid,
        in_specs=[
            pl.BlockSpec((tile, pin0), lambda i: (i, 0)),     # x: streamed per batch tile
            pl.BlockSpec(slab.shape, lambda i: (0, 0)),       # params: constant -> VMEM-resident
        ],
        out_specs=pl.BlockSpec((tile, pout_last), lambda i: (i, 0)),  # lane-dense output
        compiler_params=pltpu.CompilerParams(
            dimension_semantics=("parallel",)),               # megacore split on v7x
        cost_estimate=pl.CostEstimate(
            flops=flops, transcendentals=0, bytes_accessed=bytes_accessed),
    )(x_pad, slab)

    return out_pad[:batch, :out_size]


def init_params(key, input_size, hidden_sizes, output_size):
    """Xavier-uniform weights (nn.init.xavier_uniform_), zero biases."""
    sizes = [input_size] + list(hidden_sizes) + [output_size]
    weights, biases = [], []
    for i in range(len(sizes) - 1):
        fan_in, fan_out = sizes[i], sizes[i + 1]
        key, sub = jax.random.split(key)
        limit = jnp.sqrt(6.0 / (fan_in + fan_out))
        w = jax.random.uniform(sub, (fan_in, fan_out), jnp.float32,
                               minval=-limit, maxval=limit)
        b = jnp.zeros((1, fan_out), jnp.float32)
        weights.append(w)
        biases.append(b)
    return weights, biases


def reference_forward(x, weights, biases):
    """Plain-JAX reference mirroring the kernel's bf16-weight / f32-accumulate math."""
    num_layers = len(weights)
    h = x.astype(jnp.bfloat16)
    for i, (w, b) in enumerate(zip(weights, biases)):
        acc = jnp.dot(h, w.astype(jnp.bfloat16), preferred_element_type=jnp.float32)
        acc = acc + b.astype(jnp.bfloat16).astype(jnp.float32)
        if i < num_layers - 1:
            h = jnp.maximum(acc, 0.0).astype(jnp.bfloat16)
        else:
            return acc
    return h


if __name__ == "__main__":
    # Small, module-consistent shapes.
    batch = 8
    input_size = 32
    hidden_sizes = [64, 64]
    output_size = 16

    key = jax.random.PRNGKey(0)
    key, xkey = jax.random.split(key)
    x = jax.random.normal(xkey, (batch, input_size), jnp.float32)

    weights, biases = init_params(key, input_size, hidden_sizes, output_size)

    out = rl_coach_forward(x, weights, biases)
    out = jax.block_until_ready(out)

    ref = reference_forward(x, weights, biases)
    assert out.shape == (batch, output_size)
    assert jnp.allclose(out, ref, atol=1e-2, rtol=1e-2), "mismatch vs reference"

    print("KERNEL_OK")
</pallas_src>

<mosaic_0001>
module attributes {stable_mosaic.version = 11 : i64} {
  func.func @kernel(%arg0: i32, %arg1: memref<8x128xbf16, #tpu.memory_space<vmem>>, %arg2: memref<432x128xbf16, #tpu.memory_space<vmem>>, %arg3: memref<8x128xf32, #tpu.memory_space<vmem>>) attributes {dimension_semantics = [#tpu.dimension_semantics<parallel>], iteration_bounds = array<i64: 1>, scalar_prefetch = 0 : i64, scratch_operands = 0 : i64, tpu.core_type = #tpu.core_type<tc>, window_params = [{transform_indices = @transform_0, window_bounds = array<i64: 8, 128>}, {pipeline_mode = #tpu.pipeline_mode<synchronous>, transform_indices = @transform_1, window_bounds = array<i64: 432, 128>}, {transform_indices = @transform_2, window_bounds = array<i64: 8, 128>}]} {
    %c0 = arith.constant 0 : index
    %c0_0 = arith.constant 0 : index
    %0 = vector.load %arg1[%c0, %c0_0] : memref<8x128xbf16, #tpu.memory_space<vmem>>, vector<8x128xbf16>
    %c0_1 = arith.constant 0 : index
    %c0_2 = arith.constant 0 : index
    %1 = vector.load %arg2[%c0_1, %c0_2] : memref<432x128xbf16, #tpu.memory_space<vmem>>, vector<128x128xbf16>
    %c128 = arith.constant 128 : index
    %c0_3 = arith.constant 0 : index
    %2 = vector.load %arg2[%c128, %c0_3] : memref<432x128xbf16, #tpu.memory_space<vmem>>, vector<1x128xbf16>
    %cst = arith.constant dense<0.000000e+00> : vector<8x128xf32>
    %3 = tpu.matmul %0, %1, %cst {dimension_numbers = #tpu.dot_dimension_numbers<[1], [0], [0], [1], [0, 0, 1, 1], [], []>} : vector<8x128xbf16>, vector<128x128xbf16>, vector<8x128xf32> -> vector<8x128xf32>
    %4 = arith.extf %2 : vector<1x128xbf16> to vector<1x128xf32>
    %5 = vector.broadcast %4 : vector<1x128xf32> to vector<8x128xf32>
    %6 = arith.addf %3, %5 : vector<8x128xf32>
    %cst_4 = arith.constant 0.000000e+00 : f32
    %7 = vector.broadcast %cst_4 : f32 to vector<8x128xf32>
    %8 = arith.maximumf %6, %7 : vector<8x128xf32>
    %9 = arith.truncf %8 : vector<8x128xf32> to vector<8x128xbf16>
    %c144 = arith.constant 144 : index
    %c0_5 = arith.constant 0 : index
    %10 = vector.load %arg2[%c144, %c0_5] : memref<432x128xbf16, #tpu.memory_space<vmem>>, vector<128x128xbf16>
    %c272 = arith.constant 272 : index
    %c0_6 = arith.constant 0 : index
    %11 = vector.load %arg2[%c272, %c0_6] : memref<432x128xbf16, #tpu.memory_space<vmem>>, vector<1x128xbf16>
    %cst_7 = arith.constant dense<0.000000e+00> : vector<8x128xf32>
    %12 = tpu.matmul %9, %10, %cst_7 {dimension_numbers = #tpu.dot_dimension_numbers<[1], [0], [0], [1], [0, 0, 1, 1], [], []>} : vector<8x128xbf16>, vector<128x128xbf16>, vector<8x128xf32> -> vector<8x128xf32>
    %13 = arith.extf %11 : vector<1x128xbf16> to vector<1x128xf32>
    %14 = vector.broadcast %13 : vector<1x128xf32> to vector<8x128xf32>
    %15 = arith.addf %12, %14 : vector<8x128xf32>
    %cst_8 = arith.constant 0.000000e+00 : f32
    %16 = vector.broadcast %cst_8 : f32 to vector<8x128xf32>
    %17 = arith.maximumf %15, %16 : vector<8x128xf32>
    %18 = arith.truncf %17 : vector<8x128xf32> to vector<8x128xbf16>
    %c288 = arith.constant 288 : index
    %c0_9 = arith.constant 0 : index
    %19 = vector.load %arg2[%c288, %c0_9] : memref<432x128xbf16, #tpu.memory_space<vmem>>, vector<128x128xbf16>
    %c416 = arith.constant 416 : index
    %c0_10 = arith.constant 0 : index
    %20 = vector.load %arg2[%c416, %c0_10] : memref<432x128xbf16, #tpu.memory_space<vmem>>, vector<1x128xbf16>
    %cst_11 = arith.constant dense<0.000000e+00> : vector<8x128xf32>
    %21 = tpu.matmul %18, %19, %cst_11 {dimension_numbers = #tpu.dot_dimension_numbers<[1], [0], [0], [1], [0, 0, 1, 1], [], []>} : vector<8x128xbf16>, vector<128x128xbf16>, vector<8x128xf32> -> vector<8x128xf32>
    %22 = arith.extf %20 : vector<1x128xbf16> to vector<1x128xf32>
    %23 = vector.broadcast %22 : vector<1x128xf32> to vector<8x128xf32>
    %24 = arith.addf %21, %23 : vector<8x128xf32>
    %c0_12 = arith.constant 0 : index
    %c0_13 = arith.constant 0 : index
    %25 = vector.load %arg3[%c0_12, %c0_13] : memref<8x128xf32, #tpu.memory_space<vmem>>, vector<8x128xf32>
    tpu.vector_store %arg3[%c0_12, %c0_13], %24 {strides = array<i32>} : memref<8x128xf32, #tpu.memory_space<vmem>>, vector<8x128xf32>,
    return
  }
  func.func @transform_0(%arg0: i32) -> (i32, i32) {
    %c0_i32 = arith.constant 0 : i32
    %c0_i32_0 = arith.constant 0 : i32
    return %arg0, %c0_i32 : i32, i32
  }
  func.func @transform_1(%arg0: i32) -> (i32, i32) {
    %c0_i32 = arith.constant 0 : i32
    %c0_i32_0 = arith.constant 0 : i32
    %c0_i32_1 = arith.constant 0 : i32
    return %c0_i32, %c0_i32_0 : i32, i32
  }
  func.func @transform_2(%arg0: i32) -> (i32, i32) {
    %c0_i32 = arith.constant 0 : i32
    %c0_i32_0 = arith.constant 0 : i32
    return %arg0, %c0_i32 : i32, i32
  }
}

</mosaic_0001>

<bundles_post_ra>
// kernel: tpu_custom_call.1
= control target key start
LH: loop header
LB: loop body
LE: loop exit
PB: predicated region body
PF: predicated region fallthrough
CT: control target
= control target key end

     0   :  { %7 = vsyncpa [#allocation3], 0  ;;  %s700_s0 = inlined_call_operand.hbm [shape: bf16[8,128], index: 0, kind: input, shape index: {}]   ;;  %s701_s1 = inlined_call_operand.hbm [shape: bf16[432,128], index: 1, kind: input, shape index: {}]   ;;  %s702_s2 = inlined_call_operand.hbm [shape: f32[8,128], index: 2, kind: output, shape index: {}]  }
   0x1   :  { %8 = vsyncpa [#allocation6], 0 }
   0x2   :  { %9 = vsyncpa [#allocation4], 0  ;;  %s605_s9 = smov [#allocation2]   ;;  %s606_s11 = smov [#allocation5]  }
   0x3   :  { %s16_s10 = sshll.u32 %s605_s9, 4  ;;  %s25_s12 = sshll.u32 %s606_s11, 4  ;;  %s17_s10 = int_to_ptr.vmem [resolvable:$true] %s16_s10  ;;  %s627_s12 = int_to_ptr.vmem [resolvable:$true] %s25_s12 }
   0x4   :  { %s533_s15 = scalar_lea.hbm %s700_s0, 64 }
   0x5   :  { %p534_p0 = scmp.ne.s32.totalorder %s700_s0, %s533_s15  ;;  %p537_p1 = scmp.lt.u32.totalorder %s533_s15, %s700_s0 }
   0x7   :  { %p539_p2 = pnand %p537_p1, %p534_p0 }
   0x9   :  { %542 = shalt.err (!%p539_p2)
}
   0xa   :  { %s543_s20 = scalar_lea.vmem %s17_s10, 64  ;;  %p548_p4 = scmp.lt.s32.totalorder %s17_s10, %s17_s10 }
   0xb   :  { %p544_p3 = scmp.ne.s32.totalorder %s17_s10, %s543_s20  ;;  %p549_p5 = scmp.lt.s32.totalorder %s543_s20, %s543_s20 }
   0xd   :  { %p550_p6 = por %p549_p5, %p548_p4 }
   0xf   :  { %p551_p7 = pnand %p550_p6, %p544_p3 }
  0x11   :  { %554 = shalt.err (!%p551_p7)
}
  0x12   :  { %19 = dma.hbm_to_vmem [thread:$0]  %s700_s0, 64, %s17_s10, [#allocation3]  }
  0x13   :  { %s555_s25 = scalar_lea.hbm %s701_s1, 3456 }
  0x14   :  { %p556_p8 = scmp.ne.s32.totalorder %s701_s1, %s555_s25  ;;  %p559_p9 = scmp.lt.u32.totalorder %s555_s25, %s701_s1 }
  0x16   :  { %p561_p10 = pnand %p559_p9, %p556_p8 }
  0x18   :  { %564 = shalt.err (!%p561_p10)
}
  0x19   :  { %s565_s30 = scalar_lea.vmem %s627_s12, 3456  ;;  %p570_p12 = scmp.lt.s32.totalorder %s627_s12, %s627_s12 }
  0x1a   :  { %p566_p11 = scmp.ne.s32.totalorder %s627_s12, %s565_s30  ;;  %p571_p13 = scmp.lt.s32.totalorder %s565_s30, %s565_s30 }
  0x1c   :  { %p572_p0 = por %p571_p13, %p570_p12 }
  0x1e   :  { %p573_p1 = pnand %p572_p0, %p566_p11 }
  0x20   :  { %576 = shalt.err (!%p573_p1)
}
  0x21   :  { %s607_s0 = smov 64   ;;  %s608_s3 = smov 4  }
  0x22   :  { %31 = dma.hbm_to_vmem [thread:$0]  %s701_s1, 3456, %s627_s12, [#allocation6], %s607_s0, %s607_s0, %s608_s3  }
  0x23   :  { %599 = dma.done.wait [#allocation3], 64  }
  0x24   :  { %600 = vsyncadd [#allocation3], 4294967232 }
  0x25   :  { %601 = dma.done.wait [#allocation6], 3456  }
  0x26   :  { %602 = vsyncadd [#allocation6], 4294963840  ;;  %v609_v0 = vmov 0.0   ;;  %vm610_vm0 = vmmov 0   ;;  %v509_v1 = vld [vmem:[#allocation5] sm:$0xff]   ;;  %v510_v2 = vld [vmem:[#allocation5 + $0x8] sm:$0xff]   ;;  %v58_v24 = vlaneseq }
  0x27   :  { %442 = vmatprep.subr.bf16.mxu0 %v609_v0  ;;  %458 = vmatprep.mubr.msk.bf16.mxu0 %vm610_vm0, %v609_v0  ;;  %v511_v3 = vld [vmem:[#allocation5 + $0x10] sm:$0xff]   ;;  %v517_v4 = vld [vmem:[#allocation5 + $0x48] sm:$0xff]   ;;  %v512_v5 = vld [vmem:[#allocation5 + $0x18] sm:$0xff]   ;;  %s611_s1 = smov [#allocation7]  }
  0x28   :  { %462 = vmatprep.subr.bf16.mxu1 %v609_v0  ;;  %478 = vmatprep.mubr.msk.bf16.mxu1 %vm610_vm0, %v609_v0  ;;  %v518_v6 = vld [vmem:[#allocation5 + $0x50] sm:$0xff]   ;;  %v513_v7 = vld [vmem:[#allocation5 + $0x20] sm:$0xff]   ;;  %v519_v8 = vld [vmem:[#allocation5 + $0x58] sm:$0xff]   ;;  %v59_v25 = vshrl.u32 %v58_v24, 7  ;;  %s381_s6 = sshll.u32 %s611_s1, 4  ;;  %s382_s6 = int_to_ptr.vmem [resolvable:$true] %s381_s6 }
  0x29   :  { %443 = vmatpush3.bf16.msra.mxu0 %v509_v1  ;;  %463 = vmatpush3.bf16.msra.mxu1 %v517_v4  ;;  %v514_v9 = vld [vmem:[#allocation5 + $0x28] sm:$0xff]   ;;  %v520_v10 = vld [vmem:[#allocation5 + $0x60] sm:$0xff]   ;;  %v515_v11 = vld [vmem:[#allocation5 + $0x30] sm:$0xff]   ;;  %s577_s7 = scalar_lea.vmem %s382_s6, 128  ;;  %p582_p3 = scmp.lt.s32.totalorder %s382_s6, %s382_s6 }
  0x2a   :  { %444 = vmatprep.subr.bf16.mxu0 %v609_v0  ;;  %464 = vmatprep.subr.bf16.mxu1 %v609_v0  ;;  %v521_v12 = vld [vmem:[#allocation5 + $0x68] sm:$0xff]   ;;  %v516_v13 = vld [vmem:[#allocation5 + $0x38] sm:$0xff]   ;;  %v522_v14 = vld [vmem:[#allocation5 + $0x70] sm:$0xff]   ;;  %v60_v28 = vsub.s32 0, %v59_v25  ;;  %p578_p2 = scmp.ne.s32.totalorder %s382_s6, %s577_s7  ;;  %p583_p4 = scmp.lt.s32.totalorder %s577_s7, %s577_s7 }
  0x2b   :  { %v39_v15 = vld [vmem:[#allocation2] sm:$0xf]  ;;  %v524_v17 = vld [vmem:[#allocation5 + $0x80] sm:$0xff]   ;;  %v525_v18 = vld [vmem:[#allocation5 + $0x90] sm:$0xff]  }
  0x2c   :  { %v523_v16 = vld [vmem:[#allocation5 + $0x78] sm:$0xff]   ;;  %v527_v20 = vld [vmem:[#allocation5 + $0xa0] sm:$0xff]   ;;  %v528_v21 = vld [vmem:[#allocation5 + $0xa8] sm:$0xff]   ;;  %p584_p5 = por %p583_p4, %p582_p3 }
  0x2d   :  { %445 = vmatpush3.bf16.msra.mxu0 %v510_v2  ;;  %465 = vmatpush3.bf16.msra.mxu1 %v518_v6  ;;  %v526_v19 = vld [vmem:[#allocation5 + $0x98] sm:$0xff]   ;;  %v529_v22 = vld [vmem:[#allocation5 + $0xb0] sm:$0xff]   ;;  %v56_v26 = vld [vmem:[#allocation5 + $0x40] sm:$0x1] }
  0x2e   :  { %446 = vmatprep.subr.bf16.mxu0 %v609_v0  ;;  %466 = vmatprep.subr.bf16.mxu1 %v609_v0  ;;  %v530_v23 = vld [vmem:[#allocation5 + $0xb8] sm:$0xff]   ;;  %v57_v27 = vunpack.c.l.bf16 %v56_v26  ;;  %v531_v37 = vld [vmem:[#allocation5 + $0xc0] sm:$0xff]   ;;  %v532_v38 = vld [vmem:[#allocation5 + $0xc8] sm:$0xff]   ;;  %p585_p6 = pnand %p584_p5, %p578_p2 }
  0x2f   :  { %v168_v39 = vld [vmem:[#allocation5 + $0x88] sm:$0x1]  ;;  %v280_v49 = vld [vmem:[#allocation5 + $0xd0] sm:$0x1] }
  0x30   :  { %v61_v29 = vrot.slane %v57_v27, %v60_v28  ;;  %v169_v40 = vunpack.c.l.bf16 %v168_v39  ;;  %v281_v50 = vunpack.c.l.bf16 %v280_v49 }
  0x31   :  { %447 = vmatpush3.bf16.msra.mxu0 %v511_v3  ;;  %467 = vmatpush3.bf16.msra.mxu1 %v519_v8 }
  0x32   :  { %448 = vmatprep.subr.bf16.mxu0 %v609_v0  ;;  %468 = vmatprep.subr.bf16.mxu1 %v609_v0  ;;  %v173_v41 = vrot.slane %v169_v40, %v60_v28  ;;  %v285_v51 = vrot.slane %v281_v50, %v60_v28 }
  0x35   :  { %449 = vmatpush3.bf16.msra.mxu0 %v512_v5  ;;  %469 = vmatpush3.bf16.msra.mxu1 %v520_v10 }
  0x36   :  { %450 = vmatprep.subr.bf16.mxu0 %v609_v0  ;;  %470 = vmatprep.subr.bf16.mxu1 %v609_v0 }
  0x39   :  { %451 = vmatpush3.bf16.msra.mxu0 %v513_v7  ;;  %471 = vmatpush3.bf16.msra.mxu1 %v521_v12 }
  0x3a   :  { %452 = vmatprep.subr.bf16.mxu0 %v609_v0  ;;  %472 = vmatprep.subr.bf16.mxu1 %v609_v0 }
  0x3d   :  { %453 = vmatpush3.bf16.msra.mxu0 %v514_v9  ;;  %473 = vmatpush3.bf16.msra.mxu1 %v522_v14 }
  0x3e   :  { %454 = vmatprep.subr.bf16.mxu0 %v609_v0  ;;  %474 = vmatprep.subr.bf16.mxu1 %v609_v0 }
  0x41   :  { %455 = vmatpush3.bf16.msra.mxu0 %v515_v11  ;;  %475 = vmatpush3.bf16.msra.mxu1 %v523_v16 }
  0x42   :  { %456 = vmatprep.subr.bf16.mxu0 %v609_v0  ;;  %476 = vmatprep.subr.bf16.mxu1 %v609_v0 }
  0x45   :  { %457 = vmatpush3.bf16.msra.mxu0 %v516_v13  ;;  %477 = vmatpush3.bf16.msra.mxu1 %v524_v17 }
  0x46   :  { %482 = vmatprep.subr.bf16.mxu0 %v609_v0 }
  0x48   :  { %459 = vmatmul.mubr.bf16.vlgmr.msra.gmra.mrb[0].mxu0 %v39_v15 }
  0x49   :  { %498 = vmatprep.mubr.msk.bf16.mxu0 %vm610_vm0, %v609_v0  ;;  %483 = vmatpush3.bf16.msra.mxu0 %v525_v18 }
  0x4a   :  { %484 = vmatprep.subr.bf16.mxu0 %v609_v0 }
  0x4d   :  { %485 = vmatpush3.bf16.msra.mxu0 %v526_v19 }
  0x4e   :  { %486 = vmatprep.subr.bf16.mxu0 %v609_v0 }
  0x51   :  { %487 = vmatpush3.bf16.msra.mxu0 %v527_v20 }
  0x52   :  { %488 = vmatprep.subr.bf16.mxu0 %v609_v0 }
  0x55   :  { %489 = vmatpush3.bf16.msra.mxu0 %v528_v21 }
  0x56   :  { %490 = vmatprep.subr.bf16.mxu0 %v609_v0 }
  0x59   :  { %491 = vmatpush3.bf16.msra.mxu0 %v529_v22 }
  0x5a   :  { %492 = vmatprep.subr.bf16.mxu0 %v609_v0 }
  0x5d   :  { %493 = vmatpush3.bf16.msra.mxu0 %v530_v23 }
  0x5e   :  { %494 = vmatprep.subr.bf16.mxu0 %v609_v0 }
  0x61   :  { %495 = vmatpush3.bf16.msra.mxu0 %v531_v37 }
  0x62   :  { %496 = vmatprep.subr.bf16.mxu0 %v609_v0 }
  0x65   :  { %497 = vmatpush3.bf16.msra.mxu0 %v532_v38 }
 0x11b   :  { %v144_v30 = vpop.f32.mrb[0].mxu0 }
 0x11c   :  { %v145_v31 = vadd.f32 %v144_v30, %v61_v29  ;;  %v460_v32 = vpop.f32.mrb[1].mxu0 }
 0x11d   :  { %v147_v33 = vpop.f32.mrb[2].mxu0 }
 0x11e   :  { %v150_v34 = vmax.f32 %v145_v31, 0.0  ;;  %v461_v35 = vpop.f32.mrb[3].mxu0 }
 0x120   :  { %v151_v36 = vpack.c.bf16 %v150_v34, %v150_v34 }
 0x122   :  { %479 = vmatmul.mubr.bf16.vlgmr.msra.gmra.mrb[0].mxu1 %v151_v36 }
 0x1f5   :  { %v256_v42 = vpop.f32.mrb[0].mxu1 }
 0x1f6   :  { %v257_v43 = vadd.f32 %v256_v42, %v173_v41  ;;  %v480_v44 = vpop.f32.mrb[1].mxu1 }
 0x1f7   :  { %v259_v45 = vpop.f32.mrb[2].mxu1 }
 0x1f8   :  { %v262_v46 = vmax.f32 %v257_v43, 0.0  ;;  %v481_v47 = vpop.f32.mrb[3].mxu1 }
 0x1fa   :  { %v263_v48 = vpack.c.bf16 %v262_v46, %v262_v46 }
 0x1fc   :  { %499 = vmatmul.mubr.bf16.vlgmr.msra.gmra.mrb[4].mxu0 %v263_v48 }
 0x2cf   :  { %v368_v52 = vpop.f32.mrb[4].mxu0 }
 0x2d0   :  { %v369_v53 = vadd.f32 %v368_v52, %v285_v51  ;;  %v500_v54 = vpop.f32.mrb[5].mxu0 }
 0x2d1   :  { %v371_v55 = vpop.f32.mrb[6].mxu0 }
 0x2d2   :  { %374 = vst [vmem:[#allocation7] sm:$0xff] %v369_v53  ;;  %v501_v56 = vpop.f32.mrb[7].mxu0 }
 0x2d3   :  { %588 = shalt.err (!%p585_p6)
}
 0x2d4   :  { %s589_s10 = scalar_lea.hbm %s702_s2, 128 }
 0x2d5   :  { %p590_p7 = scmp.ne.s32.totalorder %s702_s2, %s589_s10  ;;  %p593_p8 = scmp.lt.u32.totalorder %s589_s10, %s702_s2 }
 0x2d7   :  { %p595_p9 = pnand %p593_p8, %p590_p7 }
 0x2d9   :  { %598 = shalt.err (!%p595_p9)
}
 0x2da   :  { %384 = dma.vmem_to_hbm [thread:$0]  %s382_s6, 128, %s702_s2, [#allocation4]  }
 0x2db   :  { %603 = dma.done.wait [#allocation4], 128  }
 0x2dc   :  { %604 = vsyncadd [#allocation4], 4294967168 }
 0x2dd   :  { %388 = vsyncpa [#allocation3], 1 }
 0x2de   :  { %389 = vsyncpa [#allocation6], 1 }
 0x2df   :  { %390 = vsyncpa [#allocation4], 1 }

</bundles_post_ra>
